<compile_context>
chip_gen: v5e
topology: v5e:2x2
jax: 0.10.0
libtpu: 0.0.40
codegen_flags: <defaults>
</compile_context>

<pallas_src>
import functools

import numpy as np
import jax
import jax.numpy as jnp
from jax.experimental import pallas as pl
from jax.experimental.pallas import tpu as pltpu

# ScaleNNPotential(2, 16000.0, 0.0, True, scale_potential=True, min_=0.0)
POWER = 2.0
R_MAX = 16000.0
MIN_ = 0.0


def gaiknet_kernel(xT_ref, w_ref, b_ref, out_ref, *, N):
    # xT_ref: (3N, TB) planar rows [x | y | z], batch on the lane axis.
    xT = xT_ref[...]
    xc = xT[0 * N:1 * N, :]
    yc = xT[1 * N:2 * N, :]
    zc = xT[2 * N:3 * N, :]

    # --- Cart2_Pines_Sph_Layer (x/r) followed by Inv_R_Layer (*1/r) == x/r^2
    r2 = xc * xc + yc * yc + zc * zc                  # (N, TB)
    # NOTE: matches torch semantics — a point at the origin yields inf/NaN.
    inv_r2 = pl.reciprocal(r2, approx=True)           # EUP slot, ~free
    feat = jnp.concatenate([xc * inv_r2, yc * inv_r2, zc * inv_r2], axis=0)

    # --- fc = nn.Linear(3N, 4N): single MXU matmul, batch on lanes.
    # NN-half rows of W/b were pre-scaled by 1/r_max**power in the wrapper.
    y = jnp.dot(w_ref[...], feat, preferred_element_type=jnp.float32) + b_ref[...]

    # TODO(synk): AnalyticModelLayer / ScaleNNPotential / FuseModels /
    # EnforceBoundaryConditions definitions were not provided with GAIKnet;
    # the stand-ins below follow their names / ctor args deterministically.
    x_nn = y[:2 * N, :]          # NN half (already carries 1/r_max**2)
    x_an = y[2 * N:, :]          # analytic half
    # ScaleNNPotential + FuseModels(True) + EnforceBoundaryConditions
    out_ref[...] = jnp.maximum(x_nn * x_an + x_an, MIN_)


def gaiknet_forward(x, W, b, N):
    """x: (B, 3N) planar cartesian coords; W: (4N, 3N) torch layout; b: (4N,)."""
    B = x.shape[0]
    assert x.shape == (B, 3 * N)

    # Fold ScaleNNPotential's 1/r_max**power into the NN output half (rows 0:2N).
    scale = 1.0 / (R_MAX ** POWER)
    W_f = jnp.concatenate([W[:2 * N] * scale, W[2 * N:]], axis=0)      # (4N, 3N)
    b_f = jnp.concatenate([b[:2 * N] * scale, b[2 * N:]], axis=0)
    b_f = b_f.reshape(4 * N, 1)

    # Transpose so the batch sits on the 128-lane axis (layout plumbing only).
    xT = x.T                                                           # (3N, B)

    # Batch tile: biggest lane-aligned tile that divides B (full B otherwise).
    if B % 128 == 0:
        tb = 512 if B % 512 == 0 else (256 if B % 256 == 0 else 128)
    else:
        tb = B
    grid = (B // tb,)

    kernel = functools.partial(gaiknet_kernel, N=N)
    outT = pl.pallas_call(
        kernel,
        out_shape=jax.ShapeDtypeStruct((2 * N, B), jnp.float32),
        grid=grid,
        in_specs=[
            pl.BlockSpec((3 * N, tb), lambda i: (0, i)),       # x^T batch tile
            pl.BlockSpec((4 * N, 3 * N), lambda i: (0, 0)),    # W, resident
            pl.BlockSpec((4 * N, 1), lambda i: (0, 0)),        # b, resident
        ],
        out_specs=pl.BlockSpec((2 * N, tb), lambda i: (0, i)),
        compiler_params=pltpu.CompilerParams(
            dimension_semantics=("parallel",),                 # v7x megacore
            vmem_limit_bytes=32 * 1024 * 1024,
        ),
    )(xT, W_f, b_f)
    return outT.T   # (B, 2N) — matches the PyTorch module's output layout


def gaiknet_ref(x, W, b, N):
    """Pure-JAX reference of the same stand-in forward pass."""
    xc, yc, zc = x[:, :N], x[:, N:2 * N], x[:, 2 * N:]
    r2 = xc * xc + yc * yc + zc * zc
    feat = jnp.concatenate([xc, yc, zc], axis=1) / jnp.tile(r2, (1, 3))
    y = feat @ W.T + b
    x_nn, x_an = y[:, :2 * N], y[:, 2 * N:]
    x_scaled = x_nn * x_an / (R_MAX ** POWER)
    return jnp.maximum(x_scaled + x_an, MIN_)


if __name__ == "__main__":
    N = 8      # GAIKnet(N)
    B = 256    # small, but lane-aligned so the batch grid actually pipelines

    key = jax.random.PRNGKey(0)
    kw, kb, kx = jax.random.split(key, 3)
    bound = 1.0 / float(np.sqrt(3 * N))   # torch.nn.Linear default U(-k, k)
    W = jax.random.uniform(kw, (4 * N, 3 * N), jnp.float32, -bound, bound)
    b = jax.random.uniform(kb, (4 * N,), jnp.float32, -bound, bound)
    # planar (B, 3N) cartesian coords, km-ish scale, away from the origin
    x = jax.random.normal(kx, (B, 3 * N), jnp.float32) * 1.0e3 + 1.0e2

    out = jax.block_until_ready(gaiknet_forward(x, W, b, N))
    assert out.shape == (B, 2 * N) and out.dtype == jnp.float32

    ref = jax.block_until_ready(gaiknet_ref(x, W, b, N))
    np.testing.assert_allclose(np.asarray(out), np.asarray(ref),
                               rtol=1e-2, atol=1e-5)
    print("KERNEL_OK")
</pallas_src>

<mosaic_0001>
module attributes {stable_mosaic.version = 11 : i64} {
  func.func @gaiknet_kernel(%arg0: i32, %arg1: memref<24x256xf32, #tpu.memory_space<vmem>>, %arg2: memref<32x24xf32, #tpu.memory_space<vmem>>, %arg3: memref<32x1xf32, #tpu.memory_space<vmem>>, %arg4: memref<16x256xf32, #tpu.memory_space<vmem>>) attributes {dimension_semantics = [#tpu.dimension_semantics<parallel>], iteration_bounds = array<i64: 1>, scalar_prefetch = 0 : i64, scratch_operands = 0 : i64, tpu.core_type = #tpu.core_type<tc>, window_params = [{transform_indices = @transform_0, window_bounds = array<i64: 24, 256>}, {pipeline_mode = #tpu.pipeline_mode<synchronous>, transform_indices = @transform_1, window_bounds = array<i64: 32, 24>}, {pipeline_mode = #tpu.pipeline_mode<synchronous>, transform_indices = @transform_2, window_bounds = array<i64: 32, 1>}, {transform_indices = @transform_3, window_bounds = array<i64: 16, 256>}]} {
    %c0 = arith.constant 0 : index
    %c0_0 = arith.constant 0 : index
    %0 = vector.load %arg1[%c0, %c0_0] : memref<24x256xf32, #tpu.memory_space<vmem>>, vector<24x256xf32>
    %1 = vector.extract_strided_slice %0 {offsets = [0, 0], sizes = [8, 256], strides = [1, 1]} : vector<24x256xf32> to vector<8x256xf32>
    %2 = vector.extract_strided_slice %0 {offsets = [8, 0], sizes = [8, 256], strides = [1, 1]} : vector<24x256xf32> to vector<8x256xf32>
    %3 = vector.extract_strided_slice %0 {offsets = [16, 0], sizes = [8, 256], strides = [1, 1]} : vector<24x256xf32> to vector<8x256xf32>
    %4 = arith.mulf %1, %1 : vector<8x256xf32>
    %5 = arith.mulf %2, %2 : vector<8x256xf32>
    %6 = arith.addf %4, %5 : vector<8x256xf32>
    %7 = arith.mulf %3, %3 : vector<8x256xf32>
    %8 = arith.addf %6, %7 : vector<8x256xf32>
    %9 = tpu.reciprocal %8 {approx = true} : vector<8x256xf32> -> vector<8x256xf32>
    %10 = arith.mulf %1, %9 : vector<8x256xf32>
    %11 = arith.mulf %2, %9 : vector<8x256xf32>
    %12 = arith.mulf %3, %9 : vector<8x256xf32>
    %13 = tpu.concatenate %10, %11, %12 in 0 : vector<8x256xf32>, vector<8x256xf32>, vector<8x256xf32> -> vector<24x256xf32>
    %c0_1 = arith.constant 0 : index
    %c0_2 = arith.constant 0 : index
    %14 = vector.load %arg2[%c0_1, %c0_2] : memref<32x24xf32, #tpu.memory_space<vmem>>, vector<32x24xf32>
    %cst = arith.constant dense<0.000000e+00> : vector<32x256xf32>
    %15 = tpu.matmul %14, %13, %cst {dimension_numbers = #tpu.dot_dimension_numbers<[1], [0], [0], [1], [0, 0, 1, 1], [], []>} : vector<32x24xf32>, vector<24x256xf32>, vector<32x256xf32> -> vector<32x256xf32>
    %c0_3 = arith.constant 0 : index
    %c0_4 = arith.constant 0 : index
    %16 = vector.load %arg3[%c0_3, %c0_4] : memref<32x1xf32, #tpu.memory_space<vmem>>, vector<32x1xf32>
    %17 = vector.broadcast %16 : vector<32x1xf32> to vector<32x256xf32>
    %18 = arith.addf %15, %17 : vector<32x256xf32>
    %19 = vector.extract_strided_slice %18 {offsets = [0, 0], sizes = [16, 256], strides = [1, 1]} : vector<32x256xf32> to vector<16x256xf32>
    %20 = vector.extract_strided_slice %18 {offsets = [16, 0], sizes = [16, 256], strides = [1, 1]} : vector<32x256xf32> to vector<16x256xf32>
    %21 = arith.mulf %19, %20 : vector<16x256xf32>
    %22 = arith.addf %21, %20 : vector<16x256xf32>
    %cst_5 = arith.constant 0.000000e+00 : f32
    %23 = vector.broadcast %cst_5 : f32 to vector<16x256xf32>
    %24 = arith.maximumf %22, %23 : vector<16x256xf32>
    %c0_6 = arith.constant 0 : index
    %c0_7 = arith.constant 0 : index
    %25 = vector.load %arg4[%c0_6, %c0_7] : memref<16x256xf32, #tpu.memory_space<vmem>>, vector<16x256xf32>
    tpu.vector_store %arg4[%c0_6, %c0_7], %24 {strides = array<i32>} : memref<16x256xf32, #tpu.memory_space<vmem>>, vector<16x256xf32>,
    return
  }
  func.func @transform_0(%arg0: i32) -> (i32, i32) {
    %c0_i32 = arith.constant 0 : i32
    %c0_i32_0 = arith.constant 0 : i32
    return %c0_i32, %arg0 : i32, i32
  }
  func.func @transform_1(%arg0: i32) -> (i32, i32) {
    %c0_i32 = arith.constant 0 : i32
    %c0_i32_0 = arith.constant 0 : i32
    %c0_i32_1 = arith.constant 0 : i32
    return %c0_i32, %c0_i32_0 : i32, i32
  }
  func.func @transform_2(%arg0: i32) -> (i32, i32) {
    %c0_i32 = arith.constant 0 : i32
    %c0_i32_0 = arith.constant 0 : i32
    %c0_i32_1 = arith.constant 0 : i32
    return %c0_i32, %c0_i32_0 : i32, i32
  }
  func.func @transform_3(%arg0: i32) -> (i32, i32) {
    %c0_i32 = arith.constant 0 : i32
    %c0_i32_0 = arith.constant 0 : i32
    return %c0_i32, %arg0 : i32, i32
  }
}

</mosaic_0001>

<bundles_post_ra>
// kernel: tpu_custom_call.1
= control target key start
LH: loop header
LB: loop body
LE: loop exit
PB: predicated region body
PF: predicated region fallthrough
CT: control target
= control target key end

     0   :  { %v222_v9 = vmov 0   ;;  %s291_s0 = inlined_call_operand.vmem [shape: f32[24,256], index: 0, kind: input, shape index: {}]   ;;  %s292_s1 = inlined_call_operand.vmem [shape: f32[32,24], index: 1, kind: input, shape index: {}]   ;;  %s293_s2 = inlined_call_operand.vmem [shape: f32[32,1], index: 2, kind: input, shape index: {}]   ;;  %s294_s3 = inlined_call_operand.hbm [shape: f32[16,256], index: 3, kind: output, shape index: {}]  }
   0x1   :  { %v15_v0 = vld [vmem:[%s291_s0] sm:$0xff]  ;;  %v17_v1 = vld [vmem:[%s291_s0 + $0x10] sm:$0xff]  ;;  %v16_v6 = vld [vmem:[%s291_s0 + $0x8] sm:$0xff]  ;;  %191 = vset.pattern.permute.xlu1 %v222_v9  ;;  %190 = vset.pattern.permute.xlu0 %v222_v9 }
   0x2   :  { %v19_v2 = vld [vmem:[%s291_s0 + $0x20] sm:$0xff]  ;;  %v21_v3 = vmul.f32 %v15_v0, %v15_v0  ;;  %v23_v4 = vmul.f32 %v17_v1, %v17_v1  ;;  %v18_v7 = vld [vmem:[%s291_s0 + $0x18] sm:$0xff]  ;;  %v20_v8 = vld [vmem:[%s291_s0 + $0x28] sm:$0xff]  ;;  %v22_v10 = vmul.f32 %v16_v6, %v16_v6 }
   0x3   :  { %v27_v5 = vmul.f32 %v19_v2, %v19_v2  ;;  %v24_v11 = vmul.f32 %v18_v7, %v18_v7  ;;  %v28_v12 = vmul.f32 %v20_v8, %v20_v8  ;;  %v45_v14 = vld [vmem:[%s293_s2 + $0x10] sm:$0xff]  ;;  %v43_v15 = vld [vmem:[%s293_s2] sm:$0xff] }
   0x4   :  { %v25_v13 = vadd.f32 %v23_v4, %v21_v3  ;;  %59 = vperm.xlu1 %191, %v45_v14   ;;  %49 = vperm.xlu0 %190, %v43_v15  }
   0x5   :  { %v26_v16 = vadd.f32 %v24_v11, %v22_v10 }
   0x6   :  { %8 = vsyncpa [#allocation3], 0  ;;  %v29_v17 = vadd.f32 %v27_v5, %v25_v13  ;;  %v46_v19 = vld [vmem:[%s293_s2 + $0x18] sm:$0xff]  ;;  %v44_v20 = vld [vmem:[%s293_s2 + $0x8] sm:$0xff]  ;;  %vm67_vm0 = vcmask 195584   ;;  %s160_s14 = sshll.u32 %s294_s3, 4  ;;  %s161_s14 = int_to_ptr.hbm [resolvable:$true] %s160_s14 }
   0x7   :  { %v30_v18 = vadd.f32 %v28_v12, %v26_v16  ;;  %v39_v29 = vld [vmem:[%s292_s1] sm:$0xff]  ;;  %v41_v30 = vld [vmem:[%s292_s1 + $0x10] sm:$0xff]  ;;  %v40_v31 = vld [vmem:[%s292_s1 + $0x8] sm:$0xff]  ;;  %s224_s15 = smov 256   ;;  %s225_s16 = smov 16  }
   0x8   :  { %192 = vrcp.f32 %v29_v17  ;;  %v42_v32 = vld [vmem:[%s292_s1 + $0x18] sm:$0xff]  ;;  %s223_s1 = smov [#allocation2]  }
   0x9   :  { %194 = vrcp.f32 %v30_v18  ;;  %s158_s11 = sshll.u32 %s223_s1, 4  ;;  %s159_s11 = int_to_ptr.vmem [resolvable:$true] %s158_s11 }
   0xc   :  { %64 = vperm.xlu1 %191, %v46_v19   ;;  %54 = vperm.xlu0 %190, %v44_v20  }
   0xe   :  { %v193_v21 = vpop.eup %192 }
   0xf   :  { %v195_v22 = vpop.eup %194  ;;  %v37_v23 = vmul.f32 %v193_v21, %v19_v2  ;;  %v35_v24 = vmul.f32 %v193_v21, %v17_v1  ;;  %v33_v27 = vmul.f32 %v193_v21, %v15_v0 }
  0x10   :  { %v38_v25 = vmul.f32 %v195_v22, %v20_v8  ;;  %v36_v26 = vmul.f32 %v195_v22, %v18_v7  ;;  %v34_v28 = vmul.f32 %v195_v22, %v16_v6 }
  0x11   :  { %93 = vmatpush.msra.mxu0 %v37_v23  ;;  %180 = vmatpush.msra.mxu2 %v37_v23 }
  0x12   :  { %122 = vmatpush.msra.mxu1 %v38_v25  ;;  %183 = vmatpush.msra.mxu3 %v38_v25 }
  0x13   :  { %94 = vmatpush.msra.mxu0 %v35_v24  ;;  %181 = vmatpush.msra.mxu2 %v35_v24 }
  0x14   :  { %123 = vmatpush.msra.mxu1 %v36_v26  ;;  %184 = vmatpush.msra.mxu3 %v36_v26 }
  0x15   :  { %95 = vmatpush.msra.mxu0 %v33_v27  ;;  %182 = vmatpush.msra.mxu2 %v33_v27 }
  0x16   :  { %124 = vmatpush.msra.mxu1 %v34_v28  ;;  %185 = vmatpush.msra.mxu3 %v34_v28 }
  0x17   :  { %172 = vmatmul.msk.f32.vlgmr.msra.gmra.mxu0 %vm67_vm0, %v39_v29  ;;  %174 = vmatmul.msk.f32.vlgmr.msra.gmra.mxu2 %vm67_vm0, %v41_v30 }
  0x18   :  { %176 = vmatmul.msk.f32.vlgmr.msra.gmra.mxu1 %vm67_vm0, %v39_v29  ;;  %178 = vmatmul.msk.f32.vlgmr.msra.gmra.mxu3 %vm67_vm0, %v41_v30 }
  0x1f   :  { %173 = vmatmul.msk.f32.gmra.mxu0 %vm67_vm0, %v40_v31  ;;  %175 = vmatmul.msk.f32.gmra.mxu2 %vm67_vm0, %v42_v32 }
  0x20   :  { %177 = vmatmul.msk.f32.gmra.mxu1 %vm67_vm0, %v40_v31  ;;  %179 = vmatmul.msk.f32.gmra.mxu3 %vm67_vm0, %v42_v32 }
  0x76   :  { %v60_v34 = vpop.permute.xlu1 %59  ;;  %v50_v36 = vpop.permute.xlu0 %49 }
  0x7e   :  { %v65_v48 = vpop.permute.xlu1 %64  ;;  %v55_v51 = vpop.permute.xlu0 %54 }
  0x94   :  { %v97_v33 = vpop.f32.mrf.mxu0 }
  0x95   :  { %v126_v35 = vpop.f32.mrf.mxu1  ;;  %v98_v37 = vadd.f32 %v97_v33, %v50_v36 }
  0x96   :  { %v127_v38 = vadd.f32 %v126_v35, %v50_v36 }
  0x9a   :  { %v103_v39 = vpop.f32.mrf.mxu2 }
  0x9b   :  { %v104_v40 = vadd.f32 %v103_v39, %v60_v34  ;;  %v132_v41 = vpop.f32.mrf.mxu3 }
  0x9c   :  { %v133_v42 = vadd.f32 %v132_v41, %v60_v34  ;;  %v100_v47 = vpop.f32.mrf.mxu0 }
  0x9d   :  { %v138_v43 = vmul.f32 %v104_v40, %v98_v37  ;;  %v129_v50 = vpop.f32.mrf.mxu1  ;;  %v101_v54 = vadd.f32 %v100_v47, %v55_v51 }
  0x9e   :  { %v139_v44 = vmul.f32 %v133_v42, %v127_v38  ;;  %v130_v57 = vadd.f32 %v129_v50, %v55_v51 }
  0x9f   :  { %v142_v45 = vadd.f32 %v138_v43, %v104_v40 }
  0xa0   :  { %v143_v46 = vadd.f32 %v139_v44, %v133_v42 }
  0xa1   :  { %v146_v49 = vmax.f32 %v142_v45, 0.0 }
  0xa2   :  { %v147_v52 = vmax.f32 %v143_v46, 0.0  ;;  %v106_v53 = vpop.f32.mrf.mxu2 }
  0xa3   :  { %150 = vst [vmem:[#allocation2] sm:$0xff] %v146_v49  ;;  %v107_v55 = vadd.f32 %v106_v53, %v65_v48  ;;  %v135_v56 = vpop.f32.mrf.mxu3 }
  0xa4   :  { %151 = vst [vmem:[#allocation2 + $0x8] sm:$0xff] %v147_v52  ;;  %v136_v58 = vadd.f32 %v135_v56, %v65_v48 }
  0xa5   :  { %v140_v59 = vmul.f32 %v107_v55, %v101_v54 }
  0xa6   :  { %v141_v60 = vmul.f32 %v136_v58, %v130_v57 }
  0xa7   :  { %v144_v61 = vadd.f32 %v140_v59, %v107_v55 }
  0xa8   :  { %v145_v62 = vadd.f32 %v141_v60, %v136_v58 }
  0xa9   :  { %v148_v63 = vmax.f32 %v144_v61, 0.0 }
  0xaa   :  { %v149_v0 = vmax.f32 %v145_v62, 0.0 }
  0xab   :  { %152 = vst [vmem:[#allocation2 + $0x10] sm:$0xff] %v148_v63 }
  0xac   :  { %153 = vst [vmem:[#allocation2 + $0x18] sm:$0xff] %v149_v0 }
  0xad   :  { %166 = dma.vmem_to_hbm [thread:$0]  %s159_s11, 512, %s161_s14, [#allocation3], %s224_s15, %s224_s15, %s225_s16  }
  0xae   :  { %220 = dma.done.wait [#allocation3], 512  }
  0xaf   :  { %221 = vsyncadd [#allocation3], 4294966784 }
  0xb0   :  { %171 = vsyncpa [#allocation3], 1 }

</bundles_post_ra>
